<compile_context>
chip_gen: v7x
topology: tpu7x:2x2x1
jax: 0.10.0
libtpu: 0.0.40
codegen_flags: <defaults>
</compile_context>

<pallas_src>
import functools

import jax
import jax.numpy as jnp
import numpy as np
from jax import lax
from jax.experimental import pallas as pl
from jax.experimental.pallas import tpu as pltpu


def _round_up(x, m):
    return (x + m - 1) // m * m


def _ntxent_lse_kernel(rows_ref, cols_ref, out_ref, m_sc, l_sc, *,
                       n_valid, pad_cols, precision):
    """Online logsumexp over masked similarity logits, one (row,col) tile/step.

    rows_ref: (row_tile, d_pad)  pre-normalized, pre-scaled by 1/T
    cols_ref: (col_tile, d_pad)  pre-normalized
    out_ref:  (row_tile, 1)      per-row logsumexp, written on the last col tile
    """
    i = pl.program_id(0)                       # row tile ("parallel")
    j = pl.program_id(1)                       # col tile (reduction, "arbitrary")
    row_tile = rows_ref.shape[0]
    col_tile = cols_ref.shape[0]

    @pl.when(j == 0)
    def _init():
        m_sc[...] = jnp.full_like(m_sc, -jnp.inf)
        l_sc[...] = jnp.zeros_like(l_sc)

    # Logits straight off the MXU: operands already carry the normalization and
    # the 1/temperature factor, so no per-tile VPU fixups are needed.
    logits = lax.dot_general(
        rows_ref[...], cols_ref[...],
        dimension_numbers=(((1,), (1,)), ((), ())),
        preferred_element_type=jnp.float32,
        precision=precision)                   # (row_tile, col_tile)

    def _update(vals):
        m_prev = m_sc[...]
        m_new = jnp.maximum(m_prev, jnp.max(vals, axis=-1, keepdims=True))
        l_sc[...] = (jnp.exp(m_prev - m_new) * l_sc[...]
                     + jnp.sum(jnp.exp(vals - m_new), axis=-1, keepdims=True))
        m_sc[...] = m_new

    # Masking (diagonal of the similarity matrix / zero-padded columns) is only
    # needed on the few tiles containing those entries -> gate with pl.when so
    # the iota/compare/select work is skipped everywhere else.
    row_lo = i * row_tile
    col_lo = j * col_tile
    diag_here = jnp.logical_and(row_lo < col_lo + col_tile,
                                col_lo < row_lo + row_tile)
    need_mask = diag_here
    if pad_cols:
        need_mask = jnp.logical_or(need_mask, j == pl.num_programs(1) - 1)

    @pl.when(need_mask)
    def _masked():
        grow = row_lo + lax.broadcasted_iota(jnp.int32, (row_tile, col_tile), 0)
        gcol = col_lo + lax.broadcasted_iota(jnp.int32, (row_tile, col_tile), 1)
        bad = grow == gcol
        if pad_cols:
            bad = jnp.logical_or(bad, gcol >= n_valid)
        _update(jnp.where(bad, jnp.float32(-1e30), logits))

    @pl.when(jnp.logical_not(need_mask))
    def _plain():
        _update(logits)

    @pl.when(j == pl.num_programs(1) - 1)
    def _finish():
        out_ref[...] = m_sc[...] + jnp.log(l_sc[...])


def ntxent_loss(zis, zjs, *, batch_size, temperature, use_cosine_similarity=True):
    assert zis.shape == zjs.shape and zis.shape[0] == batch_size
    d = zis.shape[1]
    n = 2 * batch_size
    inv_temp = jnp.float32(1.0 / float(temperature))

    # representations = torch.cat([zjs, zis], dim=0)
    reps = jnp.concatenate([zjs, zis], axis=0).astype(jnp.float32)
    if use_cosine_similarity:
        # Cosine pre-normalization once (O(n*D)); clamp the squared norm.
        reps = reps * lax.rsqrt(
            jnp.maximum(jnp.sum(reps * reps, axis=-1, keepdims=True),
                        jnp.float32(1e-16)))

    # Positive logit per row: rep[r] . rep[(r+B) mod 2B] / T, f32 in XLA.
    pos = jnp.sum(reps * jnp.roll(reps, -batch_size, axis=0), axis=-1) * inv_temp

    # Tile sizing. bf16 row/col blocks need sublane tiles that are multiples
    # of 16 (f32 needs multiples of 8), so everything is built on 16-multiples.
    base = _round_up(n, 16)
    col_tile = min(256, base)
    n_pad = _round_up(n, col_tile)
    row_tile = col_tile
    # Grow the row tile (halves HBM column re-streaming + per-step overhead)
    # only while keeping >= 2 row tiles so the "parallel" axis still spans both
    # v7x TensorCores.
    if (2 * col_tile <= 512 and n_pad % (2 * col_tile) == 0
            and n_pad // (2 * col_tile) >= 2):
        row_tile = 2 * col_tile

    d_pad = _round_up(d, 128)                 # lane-align the MXU contraction

    # Very small temperatures amplify bf16 similarity error by 1/T; keep those
    # in f32 with a high-precision contraction (MXU multi-pass).
    high_precision = float(temperature) < 0.2
    sim_dtype = jnp.float32 if high_precision else jnp.bfloat16
    elem_bytes = 4 if high_precision else 2

    # Keep double-buffered input blocks within a conservative VMEM budget
    # (portable to v7x's smaller physical VMEM); raise the scoped limit only
    # when large feature dims actually need it.
    if (row_tile > col_tile
            and 2 * (row_tile + col_tile) * d_pad * elem_bytes > 20 * 1024 * 1024):
        row_tile = col_tile
    block_bytes = 2 * (row_tile + col_tile) * d_pad * elem_bytes
    vmem_limit = None
    if block_bytes > 20 * 1024 * 1024:
        vmem_limit = block_bytes + 16 * 1024 * 1024

    # Pad once, fold 1/T into the row operand, cast once (in XLA, not per tile).
    reps_pad = jnp.pad(reps, ((0, n_pad - n), (0, d_pad - d)))
    rows_op = (reps_pad * inv_temp).astype(sim_dtype)
    cols_op = reps_pad.astype(sim_dtype)

    grid = (n_pad // row_tile, n_pad // col_tile)
    kernel = functools.partial(
        _ntxent_lse_kernel,
        n_valid=n,
        pad_cols=(n_pad > n),
        precision=lax.Precision.HIGHEST if high_precision else None,
    )
    per_row_lse = pl.pallas_call(
        kernel,
        out_shape=jax.ShapeDtypeStruct((n_pad, 1), jnp.float32),
        grid_spec=pltpu.PrefetchScalarGridSpec(
            num_scalar_prefetch=0,
            grid=grid,
            in_specs=[pl.BlockSpec((row_tile, d_pad), lambda i, j: (i, 0)),   # rows
                      pl.BlockSpec((col_tile, d_pad), lambda i, j: (j, 0))],  # cols
            out_specs=pl.BlockSpec((row_tile, 1), lambda i, j: (i, 0)),
            scratch_shapes=[pltpu.VMEM((row_tile, 1), jnp.float32),   # running max
                            pltpu.VMEM((row_tile, 1), jnp.float32)]), # running sum
        compiler_params=pltpu.CompilerParams(
            dimension_semantics=("parallel", "arbitrary"),
            vmem_limit_bytes=vmem_limit),
    )(rows_op, cols_op)

    # loss_r = logsumexp_r - pos_r ; sum over the 2B valid rows, mean by 2B.
    return (jnp.sum(per_row_lse[:n, 0]) - jnp.sum(pos)) / jnp.float32(n)


def _ref_ntxent(zis, zjs, batch_size, temperature, use_cosine):
    """NumPy reference reproducing the PyTorch forward literally (f32)."""
    zis = np.asarray(zis, np.float32)
    zjs = np.asarray(zjs, np.float32)
    reps = np.concatenate([zjs, zis], axis=0)
    if use_cosine:
        nrm = np.linalg.norm(reps, axis=-1, keepdims=True)
        sim = (reps @ reps.T) / np.maximum(nrm * nrm.T, 1e-8)
    else:
        sim = reps @ reps.T
    N = 2 * batch_size
    l_pos = np.diagonal(sim, offset=batch_size)
    r_pos = np.diagonal(sim, offset=-batch_size)
    positives = np.concatenate([l_pos, r_pos]).reshape(N, 1)
    mask = ~(np.eye(N, dtype=bool)
             | np.eye(N, k=batch_size, dtype=bool)
             | np.eye(N, k=-batch_size, dtype=bool))
    negatives = sim[mask].reshape(N, -1)
    logits = np.concatenate([positives, negatives], axis=1) / temperature
    m = logits.max(axis=-1, keepdims=True)
    logp0 = logits[:, 0] - (m[:, 0] + np.log(np.exp(logits - m).sum(axis=-1)))
    return float(-logp0.sum() / N)


if __name__ == "__main__":
    def _check(bs, fd, temperature, use_cosine, seed, scale=1.0, tol=2e-2):
        key = jax.random.PRNGKey(seed)
        k1, k2 = jax.random.split(key)
        zis = scale * jax.random.normal(k1, (bs, fd), dtype=jnp.float32)
        zjs = scale * jax.random.normal(k2, (bs, fd), dtype=jnp.float32)
        loss = ntxent_loss(zis, zjs, batch_size=bs, temperature=temperature,
                           use_cosine_similarity=use_cosine)
        loss = jax.block_until_ready(loss)
        ref = _ref_ntxent(zis, zjs, bs, temperature, use_cosine)
        # bf16 MXU path -> loosened tolerance vs the f32 reference.
        np.testing.assert_allclose(float(loss), ref, rtol=tol, atol=tol)

    # Primary small case (cosine similarity, matches the module's usage).
    _check(bs=8, fd=32, temperature=0.5, use_cosine=True, seed=0)
    # Dot-product similarity branch.
    _check(bs=8, fd=32, temperature=1.0, use_cosine=False, seed=1, scale=0.25)
    # Multi-tile grid + row/feature padding path (2B=320 -> 2x2 grid of 256-tiles).
    _check(bs=160, fd=96, temperature=0.5, use_cosine=True, seed=2)
    # Small-temperature path: f32 operands + Precision.HIGHEST similarity.
    _check(bs=8, fd=32, temperature=0.1, use_cosine=True, seed=3)

    print("KERNEL_OK")
</pallas_src>

<mosaic_0001>
module attributes {stable_mosaic.version = 11 : i64} {
  func.func @_ntxent_lse_kernel(%arg0: i32, %arg1: i32, %arg2: memref<16x128xbf16, #tpu.memory_space<vmem>>, %arg3: memref<16x128xbf16, #tpu.memory_space<vmem>>, %arg4: memref<16x1xf32, #tpu.memory_space<vmem>>, %arg5: memref<16x1xf32, #tpu.memory_space<vmem>>, %arg6: memref<16x1xf32, #tpu.memory_space<vmem>>) attributes {dimension_semantics = [#tpu.dimension_semantics<parallel>, #tpu.dimension_semantics<arbitrary>], iteration_bounds = array<i64: 1, 1>, scalar_prefetch = 0 : i64, scratch_operands = 2 : i64, tpu.core_type = #tpu.core_type<tc>, window_params = [{transform_indices = @transform_0, window_bounds = array<i64: 16, 128>}, {transform_indices = @transform_1, window_bounds = array<i64: 16, 128>}, {transform_indices = @transform_2, window_bounds = array<i64: 16, 1>}]} {
    %c0_i32 = arith.constant 0 : i32
    %0 = arith.cmpi eq, %arg1, %c0_i32 : i32
    %1 = arith.extui %0 : i1 to i32
    %c0_i32_0 = arith.constant 0 : i32
    %2 = arith.cmpi ne, %1, %c0_i32_0 : i32
    scf.if %2 {
      %cst_11 = arith.constant 0xFF800000 : f32
      %21 = vector.broadcast %cst_11 : f32 to vector<16x1xf32>
      %c0_12 = arith.constant 0 : index
      %c0_13 = arith.constant 0 : index
      %22 = vector.load %arg5[%c0_12, %c0_13] : memref<16x1xf32, #tpu.memory_space<vmem>>, vector<16x1xf32>
      tpu.vector_store %arg5[%c0_12, %c0_13], %21 {strides = array<i32>} : memref<16x1xf32, #tpu.memory_space<vmem>>, vector<16x1xf32>,
      %cst_14 = arith.constant 0.000000e+00 : f32
      %23 = vector.broadcast %cst_14 : f32 to vector<16x1xf32>
      %c0_15 = arith.constant 0 : index
      %c0_16 = arith.constant 0 : index
      %24 = vector.load %arg6[%c0_15, %c0_16] : memref<16x1xf32, #tpu.memory_space<vmem>>, vector<16x1xf32>
      tpu.vector_store %arg6[%c0_15, %c0_16], %23 {strides = array<i32>} : memref<16x1xf32, #tpu.memory_space<vmem>>, vector<16x1xf32>,
    } else {
    }
    %c0 = arith.constant 0 : index
    %c0_1 = arith.constant 0 : index
    %3 = vector.load %arg2[%c0, %c0_1] : memref<16x128xbf16, #tpu.memory_space<vmem>>, vector<16x128xbf16>
    %c0_2 = arith.constant 0 : index
    %c0_3 = arith.constant 0 : index
    %4 = vector.load %arg3[%c0_2, %c0_3] : memref<16x128xbf16, #tpu.memory_space<vmem>>, vector<16x128xbf16>
    %cst = arith.constant dense<0.000000e+00> : vector<16x16xf32>
    %5 = tpu.matmul %3, %4, %cst {dimension_numbers = #tpu.dot_dimension_numbers<[1], [1], [0], [0], [0, 0, 1, 0], [], []>} : vector<16x128xbf16>, vector<16x128xbf16>, vector<16x16xf32> -> vector<16x16xf32>
    %c16_i32 = arith.constant 16 : i32
    %6 = arith.muli %arg0, %c16_i32 : i32
    %c16_i32_4 = arith.constant 16 : i32
    %7 = arith.muli %arg1, %c16_i32_4 : i32
    %c16_i32_5 = arith.constant 16 : i32
    %8 = arith.addi %7, %c16_i32_5 : i32
    %9 = arith.cmpi slt, %6, %8 : i32
    %c16_i32_6 = arith.constant 16 : i32
    %10 = arith.addi %6, %c16_i32_6 : i32
    %11 = arith.cmpi slt, %7, %10 : i32
    %12 = arith.andi %9, %11 : i1
    %13 = arith.extui %12 : i1 to i32
    %c0_i32_7 = arith.constant 0 : i32
    %14 = arith.cmpi ne, %13, %c0_i32_7 : i32
    scf.if %14 {
      %21 = tpu.iota {dimensions = array<i32: 0>} : vector<16x16xi32>
      %22 = vector.broadcast %6 : i32 to vector<16x16xi32>
      %23 = arith.addi %22, %21 : vector<16x16xi32>
      %24 = tpu.iota {dimensions = array<i32: 1>} : vector<16x16xi32>
      %25 = vector.broadcast %7 : i32 to vector<16x16xi32>
      %26 = arith.addi %25, %24 : vector<16x16xi32>
      %27 = arith.cmpi eq, %23, %26 : vector<16x16xi32>
      %cst_11 = arith.constant -1.000000e+30 : f32
      %28 = vector.broadcast %cst_11 : f32 to vector<16x16xf32>
      %29 = arith.select %27, %28, %5 : vector<16x16xi1>, vector<16x16xf32>
      %c0_12 = arith.constant 0 : index
      %c0_13 = arith.constant 0 : index
      %30 = vector.load %arg5[%c0_12, %c0_13] : memref<16x1xf32, #tpu.memory_space<vmem>>, vector<16x1xf32>
      %cst_14 = arith.constant dense<0xFF800000> : vector<16xf32>
      %31 = vector.multi_reduction <maximumf>, %29, %cst_14 [1] : vector<16x16xf32> to vector<16xf32>
      %32 = vector.shape_cast %31 : vector<16xf32> to vector<16x1xf32>
      %33 = arith.maximumf %30, %32 : vector<16x1xf32>
      %34 = arith.subf %30, %33 : vector<16x1xf32>
      %35 = math.exp %34 : vector<16x1xf32>
      %c0_15 = arith.constant 0 : index
      %c0_16 = arith.constant 0 : index
      %36 = vector.load %arg6[%c0_15, %c0_16] : memref<16x1xf32, #tpu.memory_space<vmem>>, vector<16x1xf32>
      %37 = arith.mulf %35, %36 : vector<16x1xf32>
      %38 = vector.broadcast %33 : vector<16x1xf32> to vector<16x16xf32>
      %39 = arith.subf %29, %38 : vector<16x16xf32>
      %40 = math.exp %39 : vector<16x16xf32>
      %cst_17 = arith.constant dense<0.000000e+00> : vector<16xf32>
      %41 = vector.multi_reduction <add>, %40, %cst_17 [1] : vector<16x16xf32> to vector<16xf32>
      %42 = vector.shape_cast %41 : vector<16xf32> to vector<16x1xf32>
      %43 = arith.addf %37, %42 : vector<16x1xf32>
      %c0_18 = arith.constant 0 : index
      %c0_19 = arith.constant 0 : index
      %44 = vector.load %arg6[%c0_18, %c0_19] : memref<16x1xf32, #tpu.memory_space<vmem>>, vector<16x1xf32>
      tpu.vector_store %arg6[%c0_18, %c0_19], %43 {strides = array<i32>} : memref<16x1xf32, #tpu.memory_space<vmem>>, vector<16x1xf32>,
      %c0_20 = arith.constant 0 : index
      %c0_21 = arith.constant 0 : index
      %45 = vector.load %arg5[%c0_20, %c0_21] : memref<16x1xf32, #tpu.memory_space<vmem>>, vector<16x1xf32>
      tpu.vector_store %arg5[%c0_20, %c0_21], %33 {strides = array<i32>} : memref<16x1xf32, #tpu.memory_space<vmem>>, vector<16x1xf32>,
    } else {
    }
    %true = arith.constant true
    %15 = arith.xori %12, %true : i1
    %16 = arith.extui %15 : i1 to i32
    %c0_i32_8 = arith.constant 0 : i32
    %17 = arith.cmpi ne, %16, %c0_i32_8 : i32
    scf.if %17 {
      %c0_11 = arith.constant 0 : index
      %c0_12 = arith.constant 0 : index
      %21 = vector.load %arg5[%c0_11, %c0_12] : memref<16x1xf32, #tpu.memory_space<vmem>>, vector<16x1xf32>
      %cst_13 = arith.constant dense<0xFF800000> : vector<16xf32>
      %22 = vector.multi_reduction <maximumf>, %5, %cst_13 [1] : vector<16x16xf32> to vector<16xf32>
      %23 = vector.shape_cast %22 : vector<16xf32> to vector<16x1xf32>
      %24 = arith.maximumf %21, %23 : vector<16x1xf32>
      %25 = arith.subf %21, %24 : vector<16x1xf32>
      %26 = math.exp %25 : vector<16x1xf32>
      %c0_14 = arith.constant 0 : index
      %c0_15 = arith.constant 0 : index
      %27 = vector.load %arg6[%c0_14, %c0_15] : memref<16x1xf32, #tpu.memory_space<vmem>>, vector<16x1xf32>
      %28 = arith.mulf %26, %27 : vector<16x1xf32>
      %29 = vector.broadcast %24 : vector<16x1xf32> to vector<16x16xf32>
      %30 = arith.subf %5, %29 : vector<16x16xf32>
      %31 = math.exp %30 : vector<16x16xf32>
      %cst_16 = arith.constant dense<0.000000e+00> : vector<16xf32>
      %32 = vector.multi_reduction <add>, %31, %cst_16 [1] : vector<16x16xf32> to vector<16xf32>
      %33 = vector.shape_cast %32 : vector<16xf32> to vector<16x1xf32>
      %34 = arith.addf %28, %33 : vector<16x1xf32>
      %c0_17 = arith.constant 0 : index
      %c0_18 = arith.constant 0 : index
      %35 = vector.load %arg6[%c0_17, %c0_18] : memref<16x1xf32, #tpu.memory_space<vmem>>, vector<16x1xf32>
      tpu.vector_store %arg6[%c0_17, %c0_18], %34 {strides = array<i32>} : memref<16x1xf32, #tpu.memory_space<vmem>>, vector<16x1xf32>,
      %c0_19 = arith.constant 0 : index
      %c0_20 = arith.constant 0 : index
      %36 = vector.load %arg5[%c0_19, %c0_20] : memref<16x1xf32, #tpu.memory_space<vmem>>, vector<16x1xf32>
      tpu.vector_store %arg5[%c0_19, %c0_20], %24 {strides = array<i32>} : memref<16x1xf32, #tpu.memory_space<vmem>>, vector<16x1xf32>,
    } else {
    }
    %c0_i32_9 = arith.constant 0 : i32
    %18 = arith.cmpi eq, %arg1, %c0_i32_9 : i32
    %19 = arith.extui %18 : i1 to i32
    %c0_i32_10 = arith.constant 0 : i32
    %20 = arith.cmpi ne, %19, %c0_i32_10 : i32
    scf.if %20 {
      %c0_11 = arith.constant 0 : index
      %c0_12 = arith.constant 0 : index
      %21 = vector.load %arg5[%c0_11, %c0_12] : memref<16x1xf32, #tpu.memory_space<vmem>>, vector<16x1xf32>
      %c0_13 = arith.constant 0 : index
      %c0_14 = arith.constant 0 : index
      %22 = vector.load %arg6[%c0_13, %c0_14] : memref<16x1xf32, #tpu.memory_space<vmem>>, vector<16x1xf32>
      %23 = math.log %22 : vector<16x1xf32>
      %24 = arith.addf %21, %23 : vector<16x1xf32>
      %c0_15 = arith.constant 0 : index
      %c0_16 = arith.constant 0 : index
      %25 = vector.load %arg4[%c0_15, %c0_16] : memref<16x1xf32, #tpu.memory_space<vmem>>, vector<16x1xf32>
      tpu.vector_store %arg4[%c0_15, %c0_16], %24 {strides = array<i32>} : memref<16x1xf32, #tpu.memory_space<vmem>>, vector<16x1xf32>,
    } else {
    }
    return
  }
  func.func @transform_0(%arg0: i32, %arg1: i32) -> (i32, i32) {
    %c0_i32 = arith.constant 0 : i32
    %c0_i32_0 = arith.constant 0 : i32
    return %arg0, %c0_i32 : i32, i32
  }
  func.func @transform_1(%arg0: i32, %arg1: i32) -> (i32, i32) {
    %c0_i32 = arith.constant 0 : i32
    %c0_i32_0 = arith.constant 0 : i32
    return %arg1, %c0_i32 : i32, i32
  }
  func.func @transform_2(%arg0: i32, %arg1: i32) -> (i32, i32) {
    %c0_i32 = arith.constant 0 : i32
    %c0_i32_0 = arith.constant 0 : i32
    return %arg0, %c0_i32 : i32, i32
  }
}

</mosaic_0001>

<bundles_post_ra>
// kernel: tpu_custom_call.1
= control target key start
LH: loop header
LB: loop body
LE: loop exit
PB: predicated region body
PF: predicated region fallthrough
CT: control target
= control target key end

     0   :  { %7 = vsyncpa [#allocation5], 0  ;;  %s404_s0 = inlined_call_operand.hbm [shape: bf16[16,128], index: 0, kind: input, shape index: {}]   ;;  %s405_s1 = inlined_call_operand.hbm [shape: bf16[16,128], index: 1, kind: input, shape index: {}]   ;;  %s406_s2 = inlined_call_operand.vmem [shape: f32[16,1], index: 2, kind: output, shape index: {}]  }
   0x1   :  { %8 = vsyncpa [#allocation7], 0  ;;  %s337_s9 = smov [#allocation4]   ;;  %s289_s13 = scalar_lea.hbm %s404_s0, 128 }
   0x2   :  { %s14_s10 = sshll.u32 %s337_s9, 4  ;;  %p290_p0 = scmp.ne.s32.totalorder %s404_s0, %s289_s13  ;;  %s15_s10 = int_to_ptr.vmem [resolvable:$true] %s14_s10 }
   0x3   :  { %p293_p1 = scmp.lt.u32.totalorder %s289_s13, %s404_s0 }
   0x5   :  { %p295_p2 = pnand %p293_p1, %p290_p0 }
   0x7   :  { %298 = shalt.err (!%p295_p2)
}
   0x8   :  { %s299_s18 = scalar_lea.vmem %s15_s10, 128  ;;  %p304_p4 = scmp.lt.s32.totalorder %s15_s10, %s15_s10 }
   0x9   :  { %p300_p3 = scmp.ne.s32.totalorder %s15_s10, %s299_s18  ;;  %p305_p5 = scmp.lt.s32.totalorder %s299_s18, %s299_s18 }
   0xb   :  { %p306_p6 = por %p305_p5, %p304_p4 }
   0xd   :  { %p307_p7 = pnand %p306_p6, %p300_p3 }
   0xf   :  { %310 = shalt.err (!%p307_p7)
}
  0x10   :  { %s338_s19 = smov 64   ;;  %s339_s20 = smov 4  }
  0x11   :  { %20 = dma.hbm_to_vmem [thread:$0]  %s404_s0, 128, %s15_s10, [#allocation5], %s338_s19, %s338_s19, %s339_s20  }
  0x12   :  { %s340_s23 = smov [#allocation6]   ;;  %s311_s27 = scalar_lea.hbm %s405_s1, 128 }
  0x13   :  { %s26_s24 = sshll.u32 %s340_s23, 4  ;;  %p312_p8 = scmp.ne.s32.totalorder %s405_s1, %s311_s27  ;;  %s27_s24 = int_to_ptr.vmem [resolvable:$true] %s26_s24 }
  0x14   :  { %p315_p9 = scmp.lt.u32.totalorder %s311_s27, %s405_s1 }
  0x16   :  { %p317_p10 = pnand %p315_p9, %p312_p8 }
  0x18   :  { %320 = shalt.err (!%p317_p10)
}
  0x19   :  { %s321_s4 = scalar_lea.vmem %s27_s24, 128  ;;  %p326_p12 = scmp.lt.s32.totalorder %s27_s24, %s27_s24 }
  0x1a   :  { %p322_p11 = scmp.ne.s32.totalorder %s27_s24, %s321_s4  ;;  %p327_p13 = scmp.lt.s32.totalorder %s321_s4, %s321_s4 }
  0x1c   :  { %p328_p0 = por %p327_p13, %p326_p12 }
  0x1e   :  { %p329_p1 = pnand %p328_p0, %p322_p11 }
  0x20   :  { %332 = shalt.err (!%p329_p1)
}
  0x21   :  { %32 = dma.hbm_to_vmem [thread:$0]  %s405_s1, 128, %s27_s24, [#allocation7], %s338_s19, %s338_s19, %s339_s20  }
  0x22   :  { %333 = dma.done.wait [#allocation5], 128  }
  0x23   :  { %334 = vsyncadd [#allocation5], 4294967168 }
  0x24   :  { %335 = dma.done.wait [#allocation7], 128  }
  0x25   :  { %336 = vsyncadd [#allocation7], 4294967168  ;;  %vm44_vm0 = vcmask 7168   ;;  %v341_v0 = vmov 0.0   ;;  %vm342_vm1 = vmmov 0   ;;  %v275_v1 = vld [vmem:[#allocation6] sm:$0xff]   ;;  %v116_v4 = vlaneseq }
  0x26   :  { %47 = vst.msk [vmem:[#allocation3] sm:$0xff] %vm44_vm0, %v341_v0  ;;  %48 = vst.msk [vmem:[#allocation3 + $0x8] sm:$0xff] %vm44_vm0, %v341_v0  ;;  %259 = vmatprep.subr.bf16.mxu0 %v341_v0  ;;  %261 = vmatprep.mubr.msk.bf16.mxu0 %vm342_vm1, %v341_v0  ;;  %v276_v2 = vld [vmem:[#allocation4] sm:$0xff]   ;;  %v343_v3 = vmov -inf   ;;  %vm132_vm3 = vcmask 130048   ;;  %v344_v16 = vmov 0  }
  0x27   :  { %260 = vmatpush3.bf16.xpose.msra.mxu0 %v275_v1  ;;  %45 = vst.msk [vmem:[#allocation2] sm:$0xff] %vm44_vm0, %v343_v3  ;;  %46 = vst.msk [vmem:[#allocation2 + $0x8] sm:$0xff] %vm44_vm0, %v343_v3  ;;  %v117_v5 = vshrl.u32 %v116_v4, 7  ;;  %v123_v6 = vand.u32 127, %v116_v4  ;;  %273 = vset.pattern.permute.xlu1 %v344_v16 }
  0x28   :  { %274 = vset.pattern.permute.xlu0 %v344_v16 }
  0x29   :  { %v118_v7 = vadd.s32 8, %v117_v5  ;;  %vm126_vm2 = vcmp.eq.s32.totalorder %v117_v5, %v123_v6 }
  0x2b   :  { %vm127_vm4 = vcmp.eq.s32.totalorder %v118_v7, %v123_v6 }
  0x2d   :  { %v147_v38 = vld [vmem:[#allocation3] sm:$0xff]  ;;  %v148_v42 = vld [vmem:[#allocation3 + $0x8] sm:$0xff] }
  0x2e   :  { %262 = vmatmul.mubr.bf16.vlgmr.msra.gmra.mrb[0].mxu0 %v276_v2  ;;  %v130_v17 = vld [vmem:[#allocation2] sm:$0xff]  ;;  %v131_v20 = vld [vmem:[#allocation2 + $0x8] sm:$0xff] }
 0x101   :  { %v99_v8 = vpop.f32.mrb[0].mxu0 }
 0x102   :  { %v128_v9 = vsel %vm126_vm2, -1e+30, %v99_v8  ;;  %v263_v10 = vpop.f32.mrb[1].mxu0 }
 0x103   :  { %v102_v11 = vpop.f32.mrb[2].mxu0  ;;  %v133_v12 = vsel %vm132_vm3, %v128_v9, -inf }
 0x104   :  { %v129_v13 = vsel %vm127_vm4, -1e+30, %v102_v11  ;;  %134 = vmax.xlane.f32.xlu0 %v133_v12  ;;  %v264_v14 = vpop.f32.mrb[3].mxu0 }
 0x105   :  { %v136_v15 = vsel %vm132_vm3, %v129_v13, -inf }
 0x108   :  { %137 = vmax.xlane.f32.xlu0 %v136_v15 }
 0x191   :  { %v135_v18 = vpop.xlane.xlu0 %134 }
 0x192   :  { %v139_v19 = vmax.f32 %v130_v17, %v135_v18 }
 0x194   :  { %v141_v21 = vsub.f32 %v130_v17, %v139_v19  ;;  %178 = vst.msk [vmem:[#allocation2] sm:$0xff] %vm44_vm0, %v139_v19  ;;  %153 = vperm.xlu1 %273, %v139_v19  }
 0x195   :  { %v138_v22 = vpop.xlane.xlu0 %137 }
 0x196   :  { %v140_v23 = vmax.f32 %v131_v20, %v138_v22  ;;  %v143_v35 = vmul.f32 1.442695, %v141_v21 }
 0x198   :  { %v142_v24 = vsub.f32 %v131_v20, %v140_v23  ;;  %179 = vst.msk [vmem:[#allocation2 + $0x8] sm:$0xff] %vm44_vm0, %v140_v23  ;;  %158 = vperm.xlu1 %273, %v140_v23  }
 0x19a   :  { %v145_v36 = vmul.f32 1.442695, %v142_v24 }
 0x19b   :  { %v236_v51 = vld [vmem:[#allocation2] sm:$0xff] }
 0x19f   :  { %v237_v55 = vld [vmem:[#allocation2 + $0x8] sm:$0xff] }
 0x213   :  { %v154_v25 = vpop.permute.xlu1 %153 }
 0x214   :  { %v161_v26 = vsub.f32 %v128_v9, %v154_v25 }
 0x216   :  { %v163_v27 = vmul.f32 1.442695, %v161_v26 }
 0x217   :  { %v159_v28 = vpop.permute.xlu1 %158 }
 0x218   :  { %277 = vpow2.f32 %v163_v27  ;;  %v162_v29 = vsub.f32 %v129_v13, %v159_v28 }
 0x21a   :  { %v165_v30 = vmul.f32 1.442695, %v162_v29 }
 0x21c   :  { %279 = vpow2.f32 %v165_v30 }
 0x21d   :  { %281 = vpow2.f32 %v143_v35 }
 0x21e   :  { %283 = vpow2.f32 %v145_v36 }
 0x222   :  { %v278_v31 = vpop.eup %277 }
 0x223   :  { %v167_v32 = vsel %vm132_vm3, %v278_v31, 0.0 }
 0x224   :  { %168 = vadd.xlane.f32.xlu0 %v167_v32 }
 0x226   :  { %v280_v33 = vpop.eup %279 }
 0x227   :  { %v170_v34 = vsel %vm132_vm3, %v280_v33, 0.0  ;;  %v282_v37 = vpop.eup %281 }
 0x228   :  { %171 = vadd.xlane.f32.xlu1 %v170_v34  ;;  %v149_v39 = vmul.f32 %v282_v37, %v147_v38  ;;  %v284_v40 = vpop.eup %283 }
 0x229   :  { %v150_v44 = vmul.f32 %v284_v40, %v148_v42 }
 0x2b1   :  { %v169_v41 = vpop.xlane.xlu0 %168 }
 0x2b2   :  { %v173_v43 = vadd.f32 %v169_v41, %v149_v39 }
 0x2b4   :  { %176 = vst.msk [vmem:[#allocation3] sm:$0xff] %vm44_vm0, %v173_v43 }
 0x2b5   :  { %v172_v45 = vpop.xlane.xlu1 %171 }
 0x2b6   :  { %v174_v46 = vadd.f32 %v172_v45, %v150_v44 }
 0x2b8   :  { %177 = vst.msk [vmem:[#allocation3 + $0x8] sm:$0xff] %vm44_vm0, %v174_v46 }
 0x2bb   :  { %v238_v47 = vld [vmem:[#allocation3] sm:$0xff] }
 0x2bc   :  { %285 = vlog2.f32 %v238_v47 }
 0x2bf   :  { %v239_v48 = vld [vmem:[#allocation3 + $0x8] sm:$0xff] }
 0x2c0   :  { %287 = vlog2.f32 %v239_v48 }
 0x2c6   :  { %v286_v49 = vpop.eup %285 }
 0x2c7   :  { %v241_v50 = vmul.f32 0.6931472, %v286_v49 }
 0x2c9   :  { %v244_v52 = vadd.f32 %v241_v50, %v236_v51 }
 0x2ca   :  { %v288_v53 = vpop.eup %287 }
 0x2cb   :  { %247 = vst.msk [vmem:[%s406_s2] sm:$0xff] %vm44_vm0, %v244_v52  ;;  %v243_v54 = vmul.f32 0.6931472, %v288_v53 }
 0x2cd   :  { %v245_v56 = vadd.f32 %v243_v54, %v237_v55 }
 0x2cf   :  { %248 = vst.msk [vmem:[%s406_s2 + $0x8] sm:$0xff] %vm44_vm0, %v245_v56 }
 0x2d0   :  { %253 = vsyncpa [#allocation5], 1 }
 0x2d1   :  { %254 = vsyncpa [#allocation7], 1 }

</bundles_post_ra>
